<compile_context>
chip_gen: v6e
topology: v6e:2x2x1
jax: 0.10.0
libtpu: 0.0.40
codegen_flags: <defaults>
</compile_context>

<pallas_src>
import functools

import jax
import jax.numpy as jnp
from jax.experimental import pallas as pl
from jax.experimental.pallas import tpu as pltpu


# ----------------------------------------------------------------------------
# helpers
# ----------------------------------------------------------------------------
def _blk(dim, pref, align):
    """Largest tile <= pref that divides `dim` and is a multiple of `align`;
    falls back to the full dim (a full-dim block is always legal)."""
    if dim <= pref:
        return dim
    t = (pref // align) * align
    while t >= align:
        if dim % t == 0:
            return t
        t -= align
    return dim


def _lane_pad(d):
    return max(128, ((d + 127) // 128) * 128)


def _sub_pad(d):
    return max(8, ((d + 7) // 8) * 8)


def _vmem_budget_bytes():
    """~75% of physical VMEM of the current generation (v7x: 64 MiB -> 48 MiB)."""
    cap = 64 * 1024 * 1024   # conservative default (v7x per-core VMEM)
    try:
        info = pltpu.get_tpu_info()
        cap = int(getattr(info, "vmem_capacity_bytes", cap))
    except Exception:
        pass
    return (cap * 3) // 4


# ----------------------------------------------------------------------------
# Tiled linear kernel (lin_l / lin_r): y = x @ W + b  (bf16 MXU, f32 accumulate)
# ----------------------------------------------------------------------------
def _linear_kernel(x_ref, w_ref, b_ref, o_ref, acc_ref):
    @pl.when(pl.program_id(2) == 0)
    def _():
        acc_ref[...] = jnp.zeros_like(acc_ref)

    acc_ref[...] += jnp.dot(x_ref[...].astype(jnp.bfloat16),
                            w_ref[...].astype(jnp.bfloat16),
                            preferred_element_type=jnp.float32)

    @pl.when(pl.program_id(2) == pl.num_programs(2) - 1)
    def _():
        o_ref[...] = (acc_ref[...] + b_ref[...]).astype(o_ref.dtype)


def pallas_linear(x, w, b, *, tm=256, tn=256, tk=512):
    M, K = x.shape
    K2, Nf = w.shape
    assert K == K2
    tm = _blk(M, tm, 8)
    if M // tm < 2:                       # v7x megacore: try to expose >= 2 row tiles
        tm_half = _blk(M, max(8, tm // 2), 8)
        if M // tm_half >= 2:
            tm = tm_half
    tn = _blk(Nf, tn, 128)
    tkk = _blk(K, tk, 128)
    return pl.pallas_call(
        _linear_kernel,
        out_shape=jax.ShapeDtypeStruct((M, Nf), jnp.float32),
        grid=(M // tm, Nf // tn, K // tkk),
        in_specs=[
            pl.BlockSpec((tm, tkk), lambda i, j, k: (i, k)),
            pl.BlockSpec((tkk, tn), lambda i, j, k: (k, j)),
            pl.BlockSpec((1, tn), lambda i, j, k: (0, j)),
        ],
        out_specs=pl.BlockSpec((tm, tn), lambda i, j, k: (i, j)),
        scratch_shapes=[pltpu.VMEM((tm, tn), jnp.float32)],
        compiler_params=pltpu.CompilerParams(
            dimension_semantics=("parallel", "parallel", "arbitrary")),
    )(x, w, b.reshape(1, Nf))


# ----------------------------------------------------------------------------
# Fused GATv2 attention kernel (flash-style online softmax, lane-dense layouts)
# ----------------------------------------------------------------------------
def _gatv2_attn_kernel(xl_ref, xlt_ref, xr_ref, e_ref, mb_ref, we_ref, att_ref,
                       b_ref, o_ref, m_ref, l_ref, acc_ref,
                       *, heads, out_ch, concat, apply_elu):
    H, C = heads, out_ch
    ED = e_ref.shape[0]
    ki = pl.program_id(1)

    @pl.when(ki == 0)
    def _init():
        m_ref[...] = jnp.full(m_ref.shape, -1e30, jnp.float32)
        l_ref[...] = jnp.zeros_like(l_ref)
        acc_ref[...] = jnp.zeros_like(acc_ref)

    mbias = mb_ref[...]        # (tq, tk) additive mask bias (0 valid / -1e30 masked)
    x_r = xr_ref[...]          # (tq, H*C)  target projections (targets on sublanes)
    x_lt = xlt_ref[...]        # (H*C, tk)  source projections (sources on lanes)
    x_l = xl_ref[...]          # (tk, H*C)  source projections (PV matmul operand)

    for h in range(H):
        # GATv2 logits (all intermediates lane-dense (tq, tk)):
        #   s[i,j] = sum_c att[h,c] * leaky_relu(x_r[i,hc] + x_l[j,hc] + e[:,i,j]@W_e[:,hc])
        # NOTE: static unroll over H*C; fine for the small head dims used here.
        s = mbias
        for c in range(C):
            hc = h * C + c
            g = x_r[:, hc:hc + 1] + x_lt[hc:hc + 1, :]      # (tq,1)+(1,tk) -> (tq,tk)
            for d in range(ED):                             # fused lin_edge: ED scalar FMAs
                g = g + e_ref[d] * we_ref[d, hc]
            g = jnp.maximum(g, 0.2 * g)                     # leaky_relu, slope 0.2
            s = s + att_ref[h, c] * g

        # Online softmax update for head h (masked entries underflow to 0 via the bias;
        # every row has at least one valid entry because densify_graph sets self-loops).
        m_prev = m_ref[:, h:h + 1]
        m_new = jnp.maximum(m_prev, jnp.max(s, axis=-1, keepdims=True))
        corr = jnp.exp(m_prev - m_new)
        p = jnp.exp(s - m_new)
        l_ref[:, h:h + 1] = corr * l_ref[:, h:h + 1] + jnp.sum(p, axis=-1, keepdims=True)
        m_ref[:, h:h + 1] = m_new
        pv = jnp.dot(p.astype(jnp.bfloat16),
                     x_l[:, h * C:(h + 1) * C].astype(jnp.bfloat16),
                     preferred_element_type=jnp.float32)
        acc_ref[:, h * C:(h + 1) * C] = corr * acc_ref[:, h * C:(h + 1) * C] + pv

    @pl.when(ki == pl.num_programs(1) - 1)
    def _finalize():
        if concat:
            for h in range(H):
                inv = pl.reciprocal(l_ref[:, h:h + 1], approx=False)
                y = acc_ref[:, h * C:(h + 1) * C] * inv + b_ref[:, h * C:(h + 1) * C]
                if apply_elu:
                    y = jnp.where(y > 0.0, y, jnp.exp(jnp.minimum(y, 0.0)) - 1.0)
                o_ref[:, h * C:(h + 1) * C] = y.astype(o_ref.dtype)
        else:
            y = acc_ref[:, 0:C] * pl.reciprocal(l_ref[:, 0:1], approx=False)
            for h in range(1, H):
                y = y + acc_ref[:, h * C:(h + 1) * C] * pl.reciprocal(
                    l_ref[:, h:h + 1], approx=False)
            y = y * (1.0 / H) + b_ref[...]
            if apply_elu:
                y = jnp.where(y > 0.0, y, jnp.exp(jnp.minimum(y, 0.0)) - 1.0)
            o_ref[...] = y.astype(o_ref.dtype)


def _attn_vmem_bytes(tq, tk, HC, ED, out_dim, H):
    """Lane/sublane-padded per-step working set, incl. double-buffered pipelined blocks."""
    f32 = 4
    in_bytes = (_sub_pad(tk) * _lane_pad(HC) * f32          # x_l
                + _sub_pad(HC) * _lane_pad(tk) * f32         # x_l^T
                + _sub_pad(tq) * _lane_pad(HC) * f32         # x_r
                + ED * _sub_pad(tq) * _lane_pad(tk) * f32    # edge attrs [ED, tq, tk]
                + _sub_pad(tq) * _lane_pad(tk) * f32         # mask bias
                + _sub_pad(1) * _lane_pad(out_dim) * f32)    # layer bias
    out_bytes = _sub_pad(tq) * _lane_pad(out_dim) * f32
    scratch = (_sub_pad(tq) * _lane_pad(H) * f32 * 2         # m, l
               + _sub_pad(tq) * _lane_pad(HC) * f32)         # acc
    temps = 8 * _sub_pad(tq) * _lane_pad(tk) * f32           # live (tq, tk) values / spill headroom
    return 2 * (in_bytes + out_bytes) + scratch + temps


def pallas_gatv2_layer(x_l, x_r, e_cf, mask_bias, w_e, att, bias, *,
                       heads, out_ch, concat, apply_elu, tq=128, tk=128):
    """x_l, x_r: [N, H*C]; e_cf: [ED, N, N]; mask_bias: [N, N] f32 (0 / -1e30);
    w_e: [ED, H*C]; att: [H, C]; bias: [1, out_dim] -> out [N, out_dim]."""
    N, HC = x_l.shape
    H, C = heads, out_ch
    assert HC == H * C
    ED = e_cf.shape[0]
    out_dim = HC if concat else C

    budget = _vmem_budget_bytes()
    tq = _blk(N, tq, 8)
    tk = _blk(N, tk, 128)
    if N // tq < 2:                           # v7x megacore: expose >= 2 parallel q tiles
        tq_half = _blk(N, max(8, tq // 2), 8)
        if N // tq_half >= 2:
            tq = tq_half
    while _attn_vmem_bytes(tq, tk, HC, ED, out_dim, H) > budget and (tk > 128 or tq > 8):
        if tk > 128:
            tk = _blk(N, max(128, tk // 2), 128)
        else:
            tq = _blk(N, max(8, tq // 2), 8)
    nq, nk = N // tq, N // tk

    x_lt = jnp.transpose(x_l)                 # [H*C, N]: sources on the lane axis

    kern = functools.partial(_gatv2_attn_kernel, heads=H, out_ch=C,
                             concat=concat, apply_elu=apply_elu)

    est = _attn_vmem_bytes(tq, tk, HC, ED, out_dim, H)
    vmem_limit = int(min(budget, max(32 * 1024 * 1024, 2 * est)))

    return pl.pallas_call(
        kern,
        out_shape=jax.ShapeDtypeStruct((N, out_dim), jnp.float32),
        grid=(nq, nk),
        in_specs=[
            pl.BlockSpec((tk, HC), lambda qi, ki: (ki, 0)),          # x_l  (PV operand)
            pl.BlockSpec((HC, tk), lambda qi, ki: (0, ki)),          # x_l^T (logit row term)
            pl.BlockSpec((tq, HC), lambda qi, ki: (qi, 0)),          # x_r
            pl.BlockSpec((ED, tq, tk), lambda qi, ki: (0, qi, ki)),  # edge attrs [ED, N, N]
            pl.BlockSpec((tq, tk), lambda qi, ki: (qi, ki)),         # additive mask bias
            pl.BlockSpec(memory_space=pltpu.MemorySpace.SMEM),       # W_e (scalar reads)
            pl.BlockSpec(memory_space=pltpu.MemorySpace.SMEM),       # att (scalar reads)
            pl.BlockSpec((1, out_dim), lambda qi, ki: (0, 0)),       # layer bias
        ],
        out_specs=pl.BlockSpec((tq, out_dim), lambda qi, ki: (qi, 0)),
        scratch_shapes=[
            pltpu.VMEM((tq, H), jnp.float32),    # running max (per head, lane-packed)
            pltpu.VMEM((tq, H), jnp.float32),    # running denom
            pltpu.VMEM((tq, HC), jnp.float32),   # running numerator (concat layout)
        ],
        compiler_params=pltpu.CompilerParams(
            dimension_semantics=("parallel", "arbitrary"),
            vmem_limit_bytes=vmem_limit),
    )(x_l, x_lt, x_r, e_cf, mask_bias, w_e, att, bias)


# ----------------------------------------------------------------------------
# GATv2Conv layer + encoder (glue around the kernels)
# ----------------------------------------------------------------------------
def gatv2_conv(x, e_cf, mask_bias, p, heads, out_ch, concat, apply_elu):
    x_l = pallas_linear(x, p["W_l"], p["b_l"])           # [N, H*C]
    x_r = pallas_linear(x, p["W_r"], p["b_r"])           # [N, H*C]
    bias = p["bias"].reshape(1, -1)
    return pallas_gatv2_layer(x_l, x_r, e_cf, mask_bias, p["W_e"], p["att"], bias,
                              heads=heads, out_ch=out_ch, concat=concat,
                              apply_elu=apply_elu)


def gatv2_encoder(x, e_cf, mask_bias, layers):
    if x.ndim == 3:
        x = x.reshape(-1, x.shape[-1])
    for cfg in layers[:-1]:
        # ELU is fused into the attention kernel's epilogue.
        x = gatv2_conv(x, e_cf, mask_bias, cfg["params"], cfg["heads"], cfg["out_ch"],
                       concat=True, apply_elu=True)
    cfg = layers[-1]
    return gatv2_conv(x, e_cf, mask_bias, cfg["params"], cfg["heads"], cfg["out_ch"],
                      concat=False, apply_elu=False)


# ----------------------------------------------------------------------------
# Graph preprocessing (sparse edge list -> dense adjacency with self-loops)
# TODO(synk): for genuinely sparse/large graphs, switch to a scalar-prefetched
# CSR neighbor-list kernel instead of the dense [N, N] formulation.
# ----------------------------------------------------------------------------
def densify_graph(edge_index, edge_attr, num_nodes):
    src, tgt = edge_index[0], edge_index[1]
    N, ed = num_nodes, edge_attr.shape[-1]
    adj = jnp.zeros((N, N), jnp.bool_).at[tgt, src].set(True)
    e_dense = jnp.zeros((N, N, ed), jnp.float32).at[tgt, src].set(edge_attr)

    # add_self_loops(fill_value='mean'): self-loop attr = mean of incoming edge attrs
    deg = jnp.zeros((N,), jnp.float32).at[tgt].add(1.0)
    attr_sum = jnp.zeros((N, ed), jnp.float32).at[tgt].add(edge_attr)
    loop_attr = attr_sum / jnp.maximum(deg, 1.0)[:, None]

    diag = jnp.arange(N)
    adj = adj.at[diag, diag].set(True)
    e_dense = e_dense.at[diag, diag].set(loop_attr)

    e_cf = jnp.transpose(e_dense, (2, 0, 1))                 # [ED, N, N] channel-major
    mask_bias = jnp.where(adj, 0.0, -1e30).astype(jnp.float32)  # additive logit bias
    return e_cf, mask_bias


# ----------------------------------------------------------------------------
# Deterministic parameter init
# ----------------------------------------------------------------------------
def _glorot(key, shape):
    fan_in, fan_out = shape[0], shape[-1]
    lim = (6.0 / (fan_in + fan_out)) ** 0.5
    return jax.random.uniform(key, shape, jnp.float32, -lim, lim)


def init_gatv2_layer(key, in_ch, out_ch, heads, edge_dim, concat):
    ks = jax.random.split(key, 4)
    hc = heads * out_ch
    bias_dim = hc if concat else out_ch
    return {
        "W_l": _glorot(ks[0], (in_ch, hc)),
        "b_l": jnp.zeros((hc,), jnp.float32),
        "W_r": _glorot(ks[1], (in_ch, hc)),
        "b_r": jnp.zeros((hc,), jnp.float32),
        "W_e": _glorot(ks[2], (edge_dim, hc)),
        "att": _glorot(ks[3], (heads, out_ch)),
        "bias": jnp.zeros((bias_dim,), jnp.float32),
    }


if __name__ == "__main__":
    key = jax.random.PRNGKey(0)
    k_x, k_e, k_p = jax.random.split(key, 3)

    # Small shapes: 8 nodes (given as a 3-D [2,4,4] feature tensor that gets flattened),
    # in=4, hidden=8, out=8, num_layers=3, edge_dim=3, heads=2.
    in_channels, hidden_channels, out_channels = 4, 8, 8
    num_layers, edge_dim, heads = 3, 3, 2
    N = 8

    x = jax.random.normal(k_x, (2, 4, in_channels), jnp.float32)  # 3-D -> view(-1, F)

    # Bidirectional ring graph (no duplicate edges, no explicit self-loops).
    fwd = [(i, (i + 1) % N) for i in range(N)]
    bwd = [((i + 1) % N, i) for i in range(N)]
    edges = fwd + bwd
    edge_index = jnp.array(edges, dtype=jnp.int32).T           # [2, E]
    edge_attr = jax.random.normal(k_e, (edge_index.shape[1], edge_dim), jnp.float32)

    e_cf, mask_bias = densify_graph(edge_index, edge_attr, N)

    # Build the encoder's layer stack exactly like GATv2Encoder.__init__.
    pkeys = jax.random.split(k_p, num_layers)
    layers = [
        {"params": init_gatv2_layer(pkeys[0], in_channels, hidden_channels, heads,
                                    edge_dim, True),
         "heads": heads, "out_ch": hidden_channels},
    ]
    for li in range(num_layers - 2):
        layers.append(
            {"params": init_gatv2_layer(pkeys[1 + li], hidden_channels * heads,
                                        hidden_channels, heads, edge_dim, True),
             "heads": heads, "out_ch": hidden_channels})
    layers.append(
        {"params": init_gatv2_layer(pkeys[-1], hidden_channels * heads,
                                    out_channels, 1, edge_dim, False),
         "heads": 1, "out_ch": out_channels})

    out = gatv2_encoder(x, e_cf, mask_bias, layers)
    out = jax.block_until_ready(out)
    assert out.shape == (N, out_channels)
    assert bool(jnp.all(jnp.isfinite(out)))
    print("KERNEL_OK")
</pallas_src>

<mosaic_0001>
module attributes {stable_mosaic.version = 11 : i64} {
  func.func @_linear_kernel(%arg0: i32, %arg1: i32, %arg2: i32, %arg3: memref<8x4xf32, #tpu.memory_space<vmem>>, %arg4: memref<4x16xf32, #tpu.memory_space<vmem>>, %arg5: memref<1x16xf32, #tpu.memory_space<vmem>>, %arg6: memref<8x16xf32, #tpu.memory_space<vmem>>, %arg7: memref<8x16xf32, #tpu.memory_space<vmem>>) attributes {dimension_semantics = [#tpu.dimension_semantics<parallel>, #tpu.dimension_semantics<parallel>, #tpu.dimension_semantics<arbitrary>], iteration_bounds = array<i64: 1, 1, 1>, scalar_prefetch = 0 : i64, scratch_operands = 1 : i64, tpu.core_type = #tpu.core_type<tc>, window_params = [{transform_indices = @transform_0, window_bounds = array<i64: 8, 4>}, {transform_indices = @transform_1, window_bounds = array<i64: 4, 16>}, {transform_indices = @transform_2, window_bounds = array<i64: 1, 16>}, {transform_indices = @transform_3, window_bounds = array<i64: 8, 16>}]} {
    %c0_i32 = arith.constant 0 : i32
    %0 = arith.cmpi eq, %arg2, %c0_i32 : i32
    %1 = arith.extui %0 : i1 to i32
    %c0_i32_0 = arith.constant 0 : i32
    %2 = arith.cmpi ne, %1, %c0_i32_0 : i32
    scf.if %2 {
      %cst_10 = arith.constant 0.000000e+00 : f32
      %14 = vector.broadcast %cst_10 : f32 to vector<8x16xf32>
      %c0_11 = arith.constant 0 : index
      %c0_12 = arith.constant 0 : index
      %15 = vector.load %arg7[%c0_11, %c0_12] : memref<8x16xf32, #tpu.memory_space<vmem>>, vector<8x16xf32>
      tpu.vector_store %arg7[%c0_11, %c0_12], %14 {strides = array<i32>} : memref<8x16xf32, #tpu.memory_space<vmem>>, vector<8x16xf32>,
    } else {
    }
    %c0 = arith.constant 0 : index
    %c0_1 = arith.constant 0 : index
    %3 = vector.load %arg7[%c0, %c0_1] : memref<8x16xf32, #tpu.memory_space<vmem>>, vector<8x16xf32>
    %c0_2 = arith.constant 0 : index
    %c0_3 = arith.constant 0 : index
    %4 = vector.load %arg3[%c0_2, %c0_3] : memref<8x4xf32, #tpu.memory_space<vmem>>, vector<8x4xf32>
    %5 = arith.truncf %4 : vector<8x4xf32> to vector<8x4xbf16>
    %c0_4 = arith.constant 0 : index
    %c0_5 = arith.constant 0 : index
    %6 = vector.load %arg4[%c0_4, %c0_5] : memref<4x16xf32, #tpu.memory_space<vmem>>, vector<4x16xf32>
    %7 = arith.truncf %6 : vector<4x16xf32> to vector<4x16xbf16>
    %cst = arith.constant dense<0.000000e+00> : vector<8x16xf32>
    %8 = tpu.matmul %5, %7, %cst {dimension_numbers = #tpu.dot_dimension_numbers<[1], [0], [0], [1], [0, 0, 1, 1], [], []>} : vector<8x4xbf16>, vector<4x16xbf16>, vector<8x16xf32> -> vector<8x16xf32>
    %9 = arith.addf %3, %8 : vector<8x16xf32>
    %c0_6 = arith.constant 0 : index
    %c0_7 = arith.constant 0 : index
    %10 = vector.load %arg7[%c0_6, %c0_7] : memref<8x16xf32, #tpu.memory_space<vmem>>, vector<8x16xf32>
    tpu.vector_store %arg7[%c0_6, %c0_7], %9 {strides = array<i32>} : memref<8x16xf32, #tpu.memory_space<vmem>>, vector<8x16xf32>,
    %c0_i32_8 = arith.constant 0 : i32
    %11 = arith.cmpi eq, %arg2, %c0_i32_8 : i32
    %12 = arith.extui %11 : i1 to i32
    %c0_i32_9 = arith.constant 0 : i32
    %13 = arith.cmpi ne, %12, %c0_i32_9 : i32
    scf.if %13 {
      %c0_10 = arith.constant 0 : index
      %c0_11 = arith.constant 0 : index
      %14 = vector.load %arg7[%c0_10, %c0_11] : memref<8x16xf32, #tpu.memory_space<vmem>>, vector<8x16xf32>
      %c0_12 = arith.constant 0 : index
      %c0_13 = arith.constant 0 : index
      %15 = vector.load %arg5[%c0_12, %c0_13] : memref<1x16xf32, #tpu.memory_space<vmem>>, vector<1x16xf32>
      %16 = vector.broadcast %15 : vector<1x16xf32> to vector<8x16xf32>
      %17 = arith.addf %14, %16 : vector<8x16xf32>
      %c0_14 = arith.constant 0 : index
      %c0_15 = arith.constant 0 : index
      %18 = vector.load %arg6[%c0_14, %c0_15] : memref<8x16xf32, #tpu.memory_space<vmem>>, vector<8x16xf32>
      tpu.vector_store %arg6[%c0_14, %c0_15], %17 {strides = array<i32>} : memref<8x16xf32, #tpu.memory_space<vmem>>, vector<8x16xf32>,
    } else {
    }
    return
  }
  func.func @transform_0(%arg0: i32, %arg1: i32, %arg2: i32) -> (i32, i32) {
    %c0_i32 = arith.constant 0 : i32
    return %arg0, %arg2 : i32, i32
  }
  func.func @transform_1(%arg0: i32, %arg1: i32, %arg2: i32) -> (i32, i32) {
    %c0_i32 = arith.constant 0 : i32
    return %arg2, %arg1 : i32, i32
  }
  func.func @transform_2(%arg0: i32, %arg1: i32, %arg2: i32) -> (i32, i32) {
    %c0_i32 = arith.constant 0 : i32
    %c0_i32_0 = arith.constant 0 : i32
    return %c0_i32, %arg1 : i32, i32
  }
  func.func @transform_3(%arg0: i32, %arg1: i32, %arg2: i32) -> (i32, i32) {
    %c0_i32 = arith.constant 0 : i32
    return %arg0, %arg1 : i32, i32
  }
}

</mosaic_0001>

<bundles_post_ra>
// kernel: tpu_custom_call.1
= control target key start
LH: loop header
LB: loop body
LE: loop exit
PB: predicated region body
PF: predicated region fallthrough
CT: control target
= control target key end

     0   :  { %vm20_vm0 = vcmask 130048   ;;  %vm31_vm1 = vcmask 1041408   ;;  %v140_v1 = vmov 0.0   ;;  %vm141_vm2 = vmmov 0   ;;  %s178_s0 = inlined_call_operand.vmem [shape: f32[8,4], index: 0, kind: input, shape index: {}]   ;;  %s179_s1 = inlined_call_operand.vmem [shape: f32[4,16], index: 1, kind: input, shape index: {}]   ;;  %s180_s2 = inlined_call_operand.vmem [shape: f32[1,16], index: 2, kind: input, shape index: {}]   ;;  %s181_s3 = inlined_call_operand.hbm [shape: f32[8,16], index: 3, kind: output, shape index: {}]  }
   0x1   :  { %v25_v0 = vld [vmem:[%s179_s1] sm:$0xf]  ;;  %21 = vst.msk [vmem:[#allocation2] sm:$0xff] %vm20_vm0, %v140_v1  ;;  %109 = vmatprep.subr.bf16.mxu0 %v140_v1  ;;  %111 = vmatprep.mubr.msk.bf16.mxu0 %vm141_vm2, %v140_v1 }
   0x2   :  { %v26_v2 = vpack.c.bf16 %v25_v0, %v25_v0  ;;  %v23_v3 = vld [vmem:[%s178_s0] sm:$0xff] }
   0x3   :  { %8 = vsyncpa [#allocation4], 0  ;;  %v24_v5 = vpack.c.bf16 %v23_v3, %v23_v3  ;;  %vm27_vm3 = vcmask 31744   ;;  %v106_v12 = vld [vmem:[%s180_s2] ss:$0 sm:$0xff]  ;;  %s142_s17 = smov [#allocation3]  }
   0x4   :  { %v33_v4 = vsel %vm31_vm1, %v26_v2, 0  ;;  %s97_s0 = sshll.u32 %s142_s17, 4  ;;  %s98_s0 = int_to_ptr.vmem [resolvable:$true] %s97_s0 }
   0x5   :  { %110 = vmatpush3.bf16.msra.mxu0 %v33_v4  ;;  %s118_s18 = scalar_lea.vmem %s98_s0, 128  ;;  %p123_p1 = scmp.lt.s32.totalorder %s98_s0, %s98_s0 }
   0x6   :  { %p119_p0 = scmp.ne.s32.totalorder %s98_s0, %s118_s18  ;;  %p124_p2 = scmp.lt.s32.totalorder %s118_s18, %s118_s18 }
   0x8   :  { %112 = vmatmul.mubr.msk.bf16.vlgmr.msra.gmra.mxu0 %vm27_vm3, %v24_v5  ;;  %v22_v6 = vld [vmem:[#allocation2] sm:$0xff]  ;;  %p125_p3 = por %p124_p2, %p123_p1 }
   0xa   :  { %p126_p4 = pnand %p125_p3, %p119_p0 }
  0xc8   :  { %v69_v7 = vpop.f32.mrf.mxu0 }
  0xc9   :  { %v75_v8 = vadd.f32 %v69_v7, %v22_v6 }
  0xca   :  { %v113_v9 = vpop.f32.mrf.mxu0 }
  0xcb   :  { %77 = vst.msk [vmem:[#allocation2] sm:$0xff] %vm20_vm0, %v75_v8 }
  0xcc   :  { %v72_v10 = vpop.f32.mrf.mxu0 }
  0xce   :  { %v114_v11 = vpop.f32.mrf.mxu0 }
  0xd2   :  { %v81_v13 = vld [vmem:[#allocation2] sm:$0xff] }
  0xd3   :  { %v89_v14 = vadd.f32 %v106_v12, %v81_v13 }
  0xd5   :  { %90 = vst.msk [vmem:[#allocation3] sm:$0xff] %vm20_vm0, %v89_v14 }
  0xd6   :  { %129 = shalt.err (!%p126_p4)
}
  0xd7   :  { %100 = dma.vmem_to_hbm [thread:$0]  %s98_s0, 128, %s181_s3, [#allocation4]  }
  0xd8   :  { %138 = dma.done.wait [#allocation4], 128  }
  0xd9   :  { %139 = vsyncadd [#allocation4], 4294967168 }
  0xda   :  { %104 = vsyncpa [#allocation4], 1 }

</bundles_post_ra>
